<compile_context>
chip_gen: v7x
topology: tpu7x:2x2x1
jax: 0.10.0
libtpu: 0.0.40
codegen_flags: <defaults>
</compile_context>

<pallas_src>
import functools

import jax
import jax.numpy as jnp
from jax import lax
from jax.experimental import pallas as pl
from jax.experimental.pallas import tpu as pltpu


def _round_up(x, m):
    return ((x + m - 1) // m) * m


def _cdiv(a, b):
    return (a + b - 1) // b


# --------------------- one-time hardware / capability queries ----------------


@functools.lru_cache(maxsize=None)
def _tpu_vmem_capacity_bytes() -> int:
    try:
        info = pltpu.get_tpu_info()
        v = getattr(info, "vmem_capacity_bytes", None)
        if isinstance(v, int) and v > 0:
            return v
    except Exception:
        pass
    return 64 * 1024 * 1024          # conservative fallback == v7x per-core VMEM


@functools.lru_cache(maxsize=None)
def _num_tensorcores() -> int:
    """TensorCores reachable via 'parallel' grid sharding (2 on v4/v5p/v7x, 1 on v5e/v6e)."""
    try:
        info = pltpu.get_tpu_info()
        for name in ("num_cores", "core_count", "num_tensorcores", "cores_per_chip"):
            v = getattr(info, name, None)
            if isinstance(v, int) and v > 0:
                return v
    except Exception:
        pass
    try:
        kind = jax.local_devices()[0].device_kind.lower()
    except Exception:
        return 1
    if any(tag in kind for tag in ("v4", "v5p", "v7")):
        return 2
    return 1


@functools.lru_cache(maxsize=None)
def _buffered_pipeline_supported() -> bool:
    """One-time probe: can this jax build lower pl.Buffered pipeline modes?

    Uses abstract lower+compile (no tracers, no device arrays) so it is safe to call
    at trace time and never stages anything into an enclosing jit.
    """
    if not hasattr(pl, "Buffered"):
        return False

    def _probe(res_ref, x_ref, o_ref):
        o_ref[...] = x_ref[...] + res_ref[...]

    try:
        fn = pl.pallas_call(
            _probe,
            out_shape=jax.ShapeDtypeStruct((32, 128), jnp.float32),
            grid_spec=pltpu.PrefetchScalarGridSpec(
                num_scalar_prefetch=0,
                grid=(4,),
                in_specs=[
                    pl.BlockSpec((8, 128), lambda i: (0, 0),
                                 pipeline_mode=pl.Buffered(1)),
                    pl.BlockSpec((8, 128), lambda i: (i, 0),
                                 pipeline_mode=pl.Buffered(3)),
                ],
                out_specs=pl.BlockSpec((8, 128), lambda i: (i, 0)),
            ),
        )
        jax.jit(fn).lower(jax.ShapeDtypeStruct((8, 128), jnp.float32),
                          jax.ShapeDtypeStruct((32, 128), jnp.float32)).compile()
        return True
    except Exception:
        return False


# ----------------------------- Pallas kernel --------------------------------


def _feature_kd_kernel(hs_ref, ht_ref, w_ref, b_ref, out_ref, acc_ref, *, loss):
    i = pl.program_id(1)            # token tiles handled by this core ("arbitrary")
    steps = pl.num_programs(1)
    tm = hs_ref.shape[0]

    @pl.when(i == 0)
    def _init():
        acc_ref[...] = jnp.zeros_like(acc_ref)

    # teacher_proj: nn.Linear(dim_s, dim_t). MXU matmul in the input dtype (bf16 on
    # the production path) with f32 accumulation; bias + loss math stay in f32.
    proj = jnp.dot(hs_ref[...], w_ref[...], preferred_element_type=jnp.float32)
    d = (proj + b_ref[...]) - ht_ref[...].astype(jnp.float32)

    if loss == "l1-smooth":                        # F.smooth_l1_loss, beta = 1.0
        ad = jnp.abs(d)
        t = jnp.minimum(ad, 1.0)                   # branch-free: t * (|d| - 0.5 t)
        per = t * (ad - 0.5 * t)
    else:                                          # 'l2' -> F.mse_loss
        per = d * d

    # Fold the (tm, Dp) loss tile down to (8, Dp) with a log-depth tree of VPU adds,
    # then a single small accumulate: same add count as a full-tile accumulator but
    # ~tm/8x less accumulator load/store traffic (v5e has a single vector-store slot).
    parts = [per[g * 8:(g + 1) * 8, :] for g in range(tm // 8)]
    while len(parts) > 1:
        nxt = [a + b for a, b in zip(parts[0::2], parts[1::2])]
        if len(parts) % 2:
            nxt.append(parts[-1])
        parts = nxt
    acc_ref[...] += parts[0]

    @pl.when(i == steps - 1)
    def _finalize():
        out_ref[0] = acc_ref[...]


def feature_kd_loss(h_s, h_t, w_proj, b_proj, *, loss="l1-smooth", tm=1024,
                    cast_mxu_inputs_to_bf16=True):
    """h_s: [M, dim_s] student tokens, h_t: [M, dim_t] teacher tokens,
    w_proj: [dim_s, dim_t] (transposed nn.Linear weight), b_proj: [dim_t].
    Returns the scalar mean distillation loss. Fully jit-compatible."""
    assert loss in ("l1-smooth", "l2")
    M, dim_s = h_s.shape
    Mt, dim_t = h_t.shape
    assert M == Mt and w_proj.shape == (dim_s, dim_t) and b_proj.shape == (dim_t,)

    # MXU operands: bf16-native matmul with f32 accumulation. f32 x f32 on the MXU
    # lowers to multi-pass emulation and doubles student-feature HBM traffic.
    if cast_mxu_inputs_to_bf16 and jnp.dtype(h_s.dtype) == jnp.float32:
        h_s = h_s.astype(jnp.bfloat16)
    w_proj = w_proj.astype(h_s.dtype)
    b_f32 = b_proj.astype(jnp.float32)

    # Lane-dense layout: pad embedding dims to multiples of 128 (no-op for typical
    # ViT dims 384/768/1024/1536). Zero-padded columns contribute exactly 0.
    dim_s_p = _round_up(dim_s, 128)
    dim_t_p = _round_up(dim_t, 128)

    n_cores = _num_tensorcores()
    n_split = max(1, min(n_cores, _cdiv(M, 16)))

    # Token tile: multiple of 16 (bf16 sublane packing), no larger than per-core work.
    tm = max(16, min(_round_up(int(tm), 16), _round_up(_cdiv(M, n_split), 16)))

    hs_item = jnp.dtype(h_s.dtype).itemsize
    ht_item = jnp.dtype(h_t.dtype).itemsize
    w_item = jnp.dtype(w_proj.dtype).itemsize

    vmem_capacity = _tpu_vmem_capacity_bytes()
    vmem_limit = min((vmem_capacity * 3) // 4, 112 * 1024 * 1024)  # 48 MiB v7x, 96 MiB v5e/v6e
    budget = (vmem_limit * 7) // 8
    buffered_ok = _buffered_pipeline_supported()
    n_param_buf = 1 if buffered_ok else 2

    def _vmem_estimate(tm_, n_feat_buf):
        feat = n_feat_buf * tm_ * (dim_s_p * hs_item + dim_t_p * ht_item)
        params = n_param_buf * (dim_s_p * dim_t_p * w_item + 2 * dim_t_p * 4)
        inter = 3 * tm_ * dim_t_p * 4                 # f32 proj / d / per intermediates
        acc_out = (8 + 2 * 8) * dim_t_p * 4
        return feat + params + inter + acc_out

    n_feat_buf = 3 if (buffered_ok and _vmem_estimate(tm, 3) <= budget) else 2
    while _vmem_estimate(tm, n_feat_buf) > budget and tm > 64:
        tm = max(64, 16 * ((tm // 2) // 16))

    chunk = n_split * tm
    M_pad = _round_up(M, chunk)
    steps = M_pad // chunk

    # TODO(synk): on HBM-bound v5e the token-axis pad below is an extra read+write of
    # both feature streams when M % chunk != 0; an overlapped last tile + in-kernel
    # mask would avoid the copy. Lane pads are no-ops for standard ViT dims.
    h_s_p = h_s
    if (M_pad - M) or (dim_s_p - dim_s):
        h_s_p = jnp.pad(h_s, ((0, M_pad - M), (0, dim_s_p - dim_s)))
    h_t_p = h_t
    if (M_pad - M) or (dim_t_p - dim_t):
        h_t_p = jnp.pad(h_t, ((0, M_pad - M), (0, dim_t_p - dim_t)))
    w_p = w_proj
    if (dim_s_p - dim_s) or (dim_t_p - dim_t):
        w_p = jnp.pad(w_proj, ((0, dim_s_p - dim_s), (0, dim_t_p - dim_t)))
    b_p = b_f32
    if dim_t_p - dim_t:
        b_p = jnp.pad(b_f32, (0, dim_t_p - dim_t))
    b_p = b_p.reshape(1, dim_t_p)

    resident_pm = dict(pipeline_mode=pl.Buffered(1)) if buffered_ok else {}
    feat_pm = (dict(pipeline_mode=pl.Buffered(3))
               if (buffered_ok and n_feat_buf == 3 and steps >= 3) else {})

    kernel = functools.partial(_feature_kd_kernel, loss=loss)

    grid_spec = pltpu.PrefetchScalarGridSpec(
        num_scalar_prefetch=0,
        grid=(n_split, steps),
        in_specs=[
            pl.BlockSpec((tm, dim_s_p), lambda c, i: (c * steps + i, 0), **feat_pm),
            pl.BlockSpec((tm, dim_t_p), lambda c, i: (c * steps + i, 0), **feat_pm),
            pl.BlockSpec((dim_s_p, dim_t_p), lambda c, i: (0, 0), **resident_pm),
            pl.BlockSpec((1, dim_t_p), lambda c, i: (0, 0), **resident_pm),
        ],
        out_specs=pl.BlockSpec((1, 8, dim_t_p), lambda c, i: (c, 0, 0)),
        scratch_shapes=[pltpu.VMEM((8, dim_t_p), jnp.float32)],
    )
    partials = pl.pallas_call(
        kernel,
        out_shape=jax.ShapeDtypeStruct((n_split, 8, dim_t_p), jnp.float32),
        grid_spec=grid_spec,
        compiler_params=pltpu.CompilerParams(
            dimension_semantics=("parallel", "arbitrary"),
            vmem_limit_bytes=int(vmem_limit),
        ),
    )(h_s_p, h_t_p, w_p, b_p)

    total = jnp.sum(partials)

    # Zero-padded token rows contribute exactly loss(bias) per row (h_s row = 0 ->
    # proj = b; h_t row = 0): subtract analytically instead of masking every tile.
    if M_pad != M:
        if loss == "l1-smooth":
            ab = jnp.abs(b_f32)
            t = jnp.minimum(ab, 1.0)
            bias_row_loss = jnp.sum(t * (ab - 0.5 * t))
        else:
            bias_row_loss = jnp.sum(b_f32 * b_f32)
        total = total - (M_pad - M) * bias_row_loss

    return total * (1.0 / float(M * dim_t))


# --------------------------- glue (plain JAX) --------------------------------


def _stub_dinov2_x_norm(x_nchw, patch_w, cls_tok, ln_scale, ln_bias, patch=14):
    # TODO(synk): the full pretrained DINOv2 transformer backbone (forward_features)
    # has no clean Pallas equivalent here; this is a deterministic patch-embed +
    # cls-token + LayerNorm stand-in producing the 'x_norm' token sequence with the
    # correct shape/dtype semantics.
    B, C, H, W = x_nchw.shape
    x = x_nchw.reshape(B, C, H // patch, patch, W // patch, patch)
    x = x.transpose(0, 2, 4, 1, 3, 5).reshape(
        B, (H // patch) * (W // patch), C * patch * patch)
    tokens = x @ patch_w                                   # [B, N, D]
    cls = jnp.broadcast_to(cls_tok, (B, 1, patch_w.shape[1]))
    h = jnp.concatenate([cls, tokens], axis=1)             # [B, 1+N, D]
    mu = h.mean(axis=-1, keepdims=True)
    var = h.var(axis=-1, keepdims=True)
    h = (h - mu) / jnp.sqrt(var + 1e-6)
    return h * ln_scale + ln_bias


def _reference_loss(h_s, h_t, w_proj, b_proj, loss):
    proj = jnp.dot(h_s.astype(jnp.float32), w_proj.astype(jnp.float32),
                   precision=lax.Precision.HIGHEST) + b_proj.astype(jnp.float32)
    d = proj - h_t.astype(jnp.float32)
    if loss == "l1-smooth":
        ad = jnp.abs(d)
        per = jnp.where(ad < 1.0, 0.5 * d * d, ad - 0.5)
    else:
        per = d * d
    return per.mean()


if __name__ == "__main__":
    key = jax.random.PRNGKey(0)
    (k_xt, k_xs, k_pwt, k_pws, k_clst, k_clss, k_w, k_b) = jax.random.split(key, 8)

    # Small synthetic config: dinov2-style patch size 14, tiny embed dims.
    B, C, H, W = 8, 3, 56, 56            # -> 4x4 = 16 patch tokens + 1 cls = 17 tokens
    patch = 14
    dim_s, dim_t = 32, 64
    n_tok = (H // patch) * (W // patch) + 1
    M = B * n_tok                        # 136 tokens total

    x_teacher = jax.random.normal(k_xt, (B, C, H, W), jnp.float32)   # NCHW
    x_student = jax.random.normal(k_xs, (B, C, H, W), jnp.float32)   # NCHW

    # Deterministic backbone stand-in parameters.
    pdim = C * patch * patch
    patch_w_t = jax.random.normal(k_pwt, (pdim, dim_t), jnp.float32) * 0.02
    patch_w_s = jax.random.normal(k_pws, (pdim, dim_s), jnp.float32) * 0.02
    cls_t = jax.random.normal(k_clst, (1, 1, dim_t), jnp.float32) * 0.02
    cls_s = jax.random.normal(k_clss, (1, 1, dim_s), jnp.float32) * 0.02
    ln_scale_t = jnp.ones((dim_t,), jnp.float32)
    ln_bias_t = jnp.zeros((dim_t,), jnp.float32)
    ln_scale_s = jnp.ones((dim_s,), jnp.float32)
    ln_bias_s = jnp.zeros((dim_s,), jnp.float32)

    # teacher_proj = nn.Linear(dim_s, dim_t): weight [dim_t, dim_s], bias [dim_t].
    w_linear = jax.random.normal(k_w, (dim_t, dim_s), jnp.float32) * (1.0 / jnp.sqrt(dim_s))
    b_linear = jax.random.normal(k_b, (dim_t,), jnp.float32) * 0.5
    w_proj = w_linear.T                                   # [dim_s, dim_t] for x @ W

    # "Backbone" forward passes (glue).
    h_t = _stub_dinov2_x_norm(x_teacher, patch_w_t, cls_t, ln_scale_t, ln_bias_t, patch=patch)
    h_s = _stub_dinov2_x_norm(x_student, patch_w_s, cls_s, ln_scale_s, ln_bias_s, patch=patch)

    h_t_flat = h_t.reshape(M, dim_t)
    h_s_flat = h_s.reshape(M, dim_s)

    ok = True

    # 1) f32 caller inputs (wrapper casts MXU operands to bf16). tm=64 so the demo
    #    exercises multi-step accumulation, the core split (if any) and the analytic
    #    padded-row bias correction. Checked against (a) a reference computed on the
    #    same bf16-cast MXU operands (tight) and (b) the full-f32 reference (loose,
    #    documents bf16-MXU quantization).
    for loss_name in ("l1-smooth", "l2"):
        kd = jax.jit(functools.partial(feature_kd_loss, loss=loss_name, tm=64))
        out = jax.block_until_ready(kd(h_s_flat, h_t_flat, w_proj, b_linear))
        ref_same = _reference_loss(h_s_flat.astype(jnp.bfloat16), h_t_flat,
                                   w_proj.astype(jnp.bfloat16), b_linear, loss_name)
        ref_f32 = _reference_loss(h_s_flat, h_t_flat, w_proj, b_linear, loss_name)
        if not jnp.allclose(out, ref_same, rtol=5e-3, atol=1e-5):
            ok = False
            print("mismatch(same-math)", loss_name, float(out), float(ref_same))
        if not jnp.allclose(out, ref_f32, rtol=2e-2, atol=1e-3):
            ok = False
            print("mismatch(f32-ref)", loss_name, float(out), float(ref_f32))

    # 2) bf16 production path with the default (large) tile -> single-step path.
    hs_bf = h_s_flat.astype(jnp.bfloat16)
    ht_bf = h_t_flat.astype(jnp.bfloat16)
    w_bf = w_proj.astype(jnp.bfloat16)
    kd_bf = jax.jit(functools.partial(feature_kd_loss, loss="l1-smooth"))
    out_bf = jax.block_until_ready(kd_bf(hs_bf, ht_bf, w_bf, b_linear))
    ref_bf = _reference_loss(hs_bf, ht_bf, w_bf, b_linear, "l1-smooth")
    if not jnp.allclose(out_bf, ref_bf, rtol=5e-3, atol=1e-4):
        ok = False
        print("mismatch bf16", float(out_bf), float(ref_bf))

    if ok:
        print("KERNEL_OK")
</pallas_src>

<mosaic_0001>
module attributes {stable_mosaic.version = 11 : i64} {
  func.func @_feature_kd_kernel(%arg0: i32, %arg1: i32, %arg2: memref<64x128xbf16, #tpu.memory_space<vmem>>, %arg3: memref<64x128xf32, #tpu.memory_space<vmem>>, %arg4: memref<128x128xbf16, #tpu.memory_space<vmem>>, %arg5: memref<1x128xf32, #tpu.memory_space<vmem>>, %arg6: memref<1x8x128xf32, #tpu.memory_space<vmem>>, %arg7: memref<8x128xf32, #tpu.memory_space<vmem>>) attributes {dimension_semantics = [#tpu.dimension_semantics<parallel>, #tpu.dimension_semantics<arbitrary>], iteration_bounds = array<i64: 1, 3>, scalar_prefetch = 0 : i64, scratch_operands = 1 : i64, tpu.core_type = #tpu.core_type<tc>, window_params = [{transform_indices = @transform_0, window_bounds = array<i64: 64, 128>}, {transform_indices = @transform_1, window_bounds = array<i64: 64, 128>}, {pipeline_mode = #tpu.pipeline_mode<synchronous>, transform_indices = @transform_2, window_bounds = array<i64: 128, 128>}, {pipeline_mode = #tpu.pipeline_mode<synchronous>, transform_indices = @transform_3, window_bounds = array<i64: 1, 128>}, {transform_indices = @transform_4, window_bounds = array<i64: 1, 8, 128>}]} {
    %c0_i32 = arith.constant 0 : i32
    %0 = arith.cmpi eq, %arg1, %c0_i32 : i32
    %1 = arith.extui %0 : i1 to i32
    %c0_i32_0 = arith.constant 0 : i32
    %2 = arith.cmpi ne, %1, %c0_i32_0 : i32
    scf.if %2 {
      %cst_15 = arith.constant 0.000000e+00 : f32
      %39 = vector.broadcast %cst_15 : f32 to vector<8x128xf32>
      %c0_16 = arith.constant 0 : index
      %c0_17 = arith.constant 0 : index
      %40 = vector.load %arg7[%c0_16, %c0_17] : memref<8x128xf32, #tpu.memory_space<vmem>>, vector<8x128xf32>
      tpu.vector_store %arg7[%c0_16, %c0_17], %39 {strides = array<i32>} : memref<8x128xf32, #tpu.memory_space<vmem>>, vector<8x128xf32>,
    } else {
    }
    %c0 = arith.constant 0 : index
    %c0_1 = arith.constant 0 : index
    %3 = vector.load %arg2[%c0, %c0_1] : memref<64x128xbf16, #tpu.memory_space<vmem>>, vector<64x128xbf16>
    %c0_2 = arith.constant 0 : index
    %c0_3 = arith.constant 0 : index
    %4 = vector.load %arg4[%c0_2, %c0_3] : memref<128x128xbf16, #tpu.memory_space<vmem>>, vector<128x128xbf16>
    %cst = arith.constant dense<0.000000e+00> : vector<64x128xf32>
    %5 = tpu.matmul %3, %4, %cst {dimension_numbers = #tpu.dot_dimension_numbers<[1], [0], [0], [1], [0, 0, 1, 1], [], []>} : vector<64x128xbf16>, vector<128x128xbf16>, vector<64x128xf32> -> vector<64x128xf32>
    %c0_4 = arith.constant 0 : index
    %c0_5 = arith.constant 0 : index
    %6 = vector.load %arg5[%c0_4, %c0_5] : memref<1x128xf32, #tpu.memory_space<vmem>>, vector<1x128xf32>
    %7 = vector.broadcast %6 : vector<1x128xf32> to vector<64x128xf32>
    %8 = arith.addf %5, %7 : vector<64x128xf32>
    %c0_6 = arith.constant 0 : index
    %c0_7 = arith.constant 0 : index
    %9 = vector.load %arg3[%c0_6, %c0_7] : memref<64x128xf32, #tpu.memory_space<vmem>>, vector<64x128xf32>
    %10 = arith.subf %8, %9 : vector<64x128xf32>
    %11 = math.absf %10 : vector<64x128xf32>
    %cst_8 = arith.constant 1.000000e+00 : f32
    %12 = vector.broadcast %cst_8 : f32 to vector<64x128xf32>
    %13 = arith.minimumf %11, %12 : vector<64x128xf32>
    %cst_9 = arith.constant 5.000000e-01 : f32
    %14 = vector.broadcast %cst_9 : f32 to vector<64x128xf32>
    %15 = arith.mulf %14, %13 : vector<64x128xf32>
    %16 = arith.subf %11, %15 : vector<64x128xf32>
    %17 = arith.mulf %13, %16 : vector<64x128xf32>
    %18 = vector.extract_strided_slice %17 {offsets = [0, 0], sizes = [8, 128], strides = [1, 1]} : vector<64x128xf32> to vector<8x128xf32>
    %19 = vector.extract_strided_slice %17 {offsets = [8, 0], sizes = [8, 128], strides = [1, 1]} : vector<64x128xf32> to vector<8x128xf32>
    %20 = vector.extract_strided_slice %17 {offsets = [16, 0], sizes = [8, 128], strides = [1, 1]} : vector<64x128xf32> to vector<8x128xf32>
    %21 = vector.extract_strided_slice %17 {offsets = [24, 0], sizes = [8, 128], strides = [1, 1]} : vector<64x128xf32> to vector<8x128xf32>
    %22 = vector.extract_strided_slice %17 {offsets = [32, 0], sizes = [8, 128], strides = [1, 1]} : vector<64x128xf32> to vector<8x128xf32>
    %23 = vector.extract_strided_slice %17 {offsets = [40, 0], sizes = [8, 128], strides = [1, 1]} : vector<64x128xf32> to vector<8x128xf32>
    %24 = vector.extract_strided_slice %17 {offsets = [48, 0], sizes = [8, 128], strides = [1, 1]} : vector<64x128xf32> to vector<8x128xf32>
    %25 = vector.extract_strided_slice %17 {offsets = [56, 0], sizes = [8, 128], strides = [1, 1]} : vector<64x128xf32> to vector<8x128xf32>
    %26 = arith.addf %18, %19 : vector<8x128xf32>
    %27 = arith.addf %20, %21 : vector<8x128xf32>
    %28 = arith.addf %22, %23 : vector<8x128xf32>
    %29 = arith.addf %24, %25 : vector<8x128xf32>
    %30 = arith.addf %26, %27 : vector<8x128xf32>
    %31 = arith.addf %28, %29 : vector<8x128xf32>
    %32 = arith.addf %30, %31 : vector<8x128xf32>
    %c0_10 = arith.constant 0 : index
    %c0_11 = arith.constant 0 : index
    %33 = vector.load %arg7[%c0_10, %c0_11] : memref<8x128xf32, #tpu.memory_space<vmem>>, vector<8x128xf32>
    %34 = arith.addf %33, %32 : vector<8x128xf32>
    %c0_12 = arith.constant 0 : index
    %c0_13 = arith.constant 0 : index
    %35 = vector.load %arg7[%c0_12, %c0_13] : memref<8x128xf32, #tpu.memory_space<vmem>>, vector<8x128xf32>
    tpu.vector_store %arg7[%c0_12, %c0_13], %34 {strides = array<i32>} : memref<8x128xf32, #tpu.memory_space<vmem>>, vector<8x128xf32>,
    %c2_i32 = arith.constant 2 : i32
    %36 = arith.cmpi eq, %arg1, %c2_i32 : i32
    %37 = arith.extui %36 : i1 to i32
    %c0_i32_14 = arith.constant 0 : i32
    %38 = arith.cmpi ne, %37, %c0_i32_14 : i32
    scf.if %38 {
      %c0_15 = arith.constant 0 : index
      %c0_16 = arith.constant 0 : index
      %39 = vector.load %arg7[%c0_15, %c0_16] : memref<8x128xf32, #tpu.memory_space<vmem>>, vector<8x128xf32>
      %c0_17 = arith.constant 0 : index
      %c0_18 = arith.constant 0 : index
      %c0_19 = arith.constant 0 : index
      %40 = vector.load %arg6[%c0_17, %c0_18, %c0_19] : memref<1x8x128xf32, #tpu.memory_space<vmem>>, vector<1x8x128xf32>
      %41 = vector.shape_cast %40 : vector<1x8x128xf32> to vector<8x128xf32>
      %42 = vector.shape_cast %39 : vector<8x128xf32> to vector<1x8x128xf32>
      tpu.vector_store %arg6[%c0_17, %c0_18, %c0_19], %42 {strides = array<i32>} : memref<1x8x128xf32, #tpu.memory_space<vmem>>, vector<1x8x128xf32>,
    } else {
    }
    return
  }
  func.func @transform_0(%arg0: i32, %arg1: i32) -> (i32, i32) {
    %c3_i32 = arith.constant 3 : i32
    %0 = arith.muli %arg0, %c3_i32 : i32
    %1 = arith.addi %0, %arg1 : i32
    %c0_i32 = arith.constant 0 : i32
    %c0_i32_0 = arith.constant 0 : i32
    return %1, %c0_i32 : i32, i32
  }
  func.func @transform_1(%arg0: i32, %arg1: i32) -> (i32, i32) {
    %c3_i32 = arith.constant 3 : i32
    %0 = arith.muli %arg0, %c3_i32 : i32
    %1 = arith.addi %0, %arg1 : i32
    %c0_i32 = arith.constant 0 : i32
    %c0_i32_0 = arith.constant 0 : i32
    return %1, %c0_i32 : i32, i32
  }
  func.func @transform_2(%arg0: i32, %arg1: i32) -> (i32, i32) {
    %c0_i32 = arith.constant 0 : i32
    %c0_i32_0 = arith.constant 0 : i32
    %c0_i32_1 = arith.constant 0 : i32
    return %c0_i32, %c0_i32_0 : i32, i32
  }
  func.func @transform_3(%arg0: i32, %arg1: i32) -> (i32, i32) {
    %c0_i32 = arith.constant 0 : i32
    %c0_i32_0 = arith.constant 0 : i32
    %c0_i32_1 = arith.constant 0 : i32
    return %c0_i32, %c0_i32_0 : i32, i32
  }
  func.func @transform_4(%arg0: i32, %arg1: i32) -> (i32, i32, i32) {
    %c0_i32 = arith.constant 0 : i32
    %c0_i32_0 = arith.constant 0 : i32
    %c0_i32_1 = arith.constant 0 : i32
    return %arg0, %c0_i32, %c0_i32_0 : i32, i32, i32
  }
}

</mosaic_0001>

<bundles_post_ra>
// kernel: feature_kd_loss.1
= control target key start
LH: loop header
LB: loop body
LE: loop exit
PB: predicated region body
PF: predicated region fallthrough
CT: control target
= control target key end

     0   :  { %s742_s15 = smov 0   ;;  %s744_s16 = smov 0   ;;  %s826_s0 = inlined_call_operand.vmem [shape: bf16[192,128], index: 0, kind: input, shape index: {}]   ;;  %s827_s1 = inlined_call_operand.vmem [shape: f32[192,128], index: 1, kind: input, shape index: {}]   ;;  %s828_s2 = inlined_call_operand.vmem [shape: bf16[128,128], index: 2, kind: input, shape index: {}]   ;;  %s829_s3 = inlined_call_operand.vmem [shape: f32[1,128], index: 3, kind: input, shape index: {}]   ;;  %s830_s4 = inlined_call_operand.vmem [shape: f32[1,8,128], index: 4, kind: output, shape index: {}]  }
   0x1   :  { %s746_s17 = smov 0  }
   0x2 LB: > { %s23_s18 = sadd.s32 1, %s710_s16  ;;  %p580_p0 = scmp.ge.s32.totalorder %s714_s17, 1  ;;  %s714_s17 = sphi %s746_s17, %s14_s17   ;;  %s710_s16 = sphi %s744_s16, %s832_s16   ;;  %s706_s15 = sphi %s742_s15, %s831_s15  }
   0x3   : > { %p24_p1 = scmp.ge.s32.totalorder %s23_s18, 3  ;;  %p202_p2 = scmp.lt.s32.totalorder %s714_s17, 4 }
   0x5   : > { %s834_s18 = smov (%p24_p1, %s23_s18), 0  ;;  %p203_p3 = pnand %p580_p0, %p202_p2 }
   0x6   : > { %s581_s19 = sshll.u32 (!%p203_p3), %s706_s15, 3  ;;  %p585_p5 = scmp.ne.s32.totalorder (!%p203_p3), %s706_s15, 0 }
   0x7   : > { %206 = sbr.rel (%p203_p3) target bundleno = 300 (0x12c), region = 36  ;;  %p239_p4 = scmp.lt.s32.totalorder (!%p203_p3), %s581_s19, 23 }
   0xe   : > { %s836_s19 = smov (!%p239_p4, %s581_s19), 23  ;;  %264 = sbr.rel (%p585_p5) target bundleno = 21 (0x15), region = 40 }
   0xf   : > { %s582_s20 = sshll.u32 %s836_s19, 2  ;;  %s584_s21 = sshll.u32 %s836_s19, 3  ;;  %v716_v0 = vmov (!%p585_p5), 0.0  }
  0x10   : > { %s766_s24 = scalar_lea.vmem %s826_s0, %s582_s20  ;;  %s771_s27 = scalar_lea.vmem %s827_s1, %s584_s21  ;;  %265 = vst [vmem:[#allocation2] sm:$0xff] (!%p585_p5), %v716_v0 }
  0x15 PF: > { %v680_v1 = vld [vmem:[%s828_s2] sm:$0xff]   ;;  %v681_v2 = vld [vmem:[%s828_s2 + $0x8] sm:$0xff]   ;;  %v682_v3 = vld [vmem:[%s828_s2 + $0x10] sm:$0xff]   ;;  %p599_p6 = scmp.ne.s32.totalorder %s706_s15, 2 }
  0x16   : > { %615 = vmatprep.subr.bf16.mxu0 %v680_v1  ;;  %639 = vmatprep.subr.bf16.mxu1 %v680_v1  ;;  %v683_v4 = vld [vmem:[%s828_s2 + $0x18] sm:$0xff]   ;;  %v688_v5 = vld [vmem:[%s766_s24] sm:$0xff]   ;;  %v689_v6 = vld [vmem:[%s766_s24 + $0x10] sm:$0xff]  }
  0x17   : > { %616 = vmatpush3.bf16.msra.mxu0 %v680_v1  ;;  %647 = vmatpush3.bf16.msra.mxu1 %v680_v1  ;;  %v684_v7 = vld [vmem:[%s828_s2 + $0x20] sm:$0xff]   ;;  %v685_v8 = vld [vmem:[%s828_s2 + $0x28] sm:$0xff]   ;;  %v686_v9 = vld [vmem:[%s828_s2 + $0x30] sm:$0xff]  }
  0x18   : > { %617 = vmatprep.subr.bf16.mxu0 %v681_v2  ;;  %640 = vmatprep.subr.bf16.mxu1 %v681_v2  ;;  %v687_v10 = vld [vmem:[%s828_s2 + $0x38] sm:$0xff]   ;;  %v690_v11 = vld [vmem:[%s766_s24 + $0x8] sm:$0xff]   ;;  %v586_v13 = vld [vmem:[%s829_s3] ss:$0 sm:$0xff] }
  0x19   : > { %631 = vmatprep.mubr.bf16.mxu0 %v688_v5  ;;  %635 = vmatprep.mubr.bf16.mxu1 %v689_v6  ;;  %v691_v12 = vld [vmem:[%s766_s24 + $0x18] sm:$0xff]   ;;  %v436_v15 = vld [vmem:[%s771_s27 + $0x10] sm:$0xff]  ;;  %v434_v21 = vld [vmem:[%s771_s27] sm:$0xff] }
  0x1a   : > { %v440_v17 = vld [vmem:[%s771_s27 + $0x30] sm:$0xff]  ;;  %v438_v23 = vld [vmem:[%s771_s27 + $0x20] sm:$0xff]  ;;  %v437_v27 = vld [vmem:[%s771_s27 + $0x18] sm:$0xff] }
  0x1b   : > { %618 = vmatpush3.bf16.msra.mxu0 %v681_v2  ;;  %648 = vmatpush3.bf16.msra.mxu1 %v681_v2  ;;  %v441_v29 = vld [vmem:[%s771_s27 + $0x38] sm:$0xff]  ;;  %v435_v35 = vld [vmem:[%s771_s27 + $0x8] sm:$0xff] }
  0x1c   : > { %619 = vmatprep.subr.bf16.mxu0 %v682_v3  ;;  %641 = vmatprep.subr.bf16.mxu1 %v682_v3  ;;  %v439_v37 = vld [vmem:[%s771_s27 + $0x28] sm:$0xff] }
  0x1f   : > { %620 = vmatpush3.bf16.msra.mxu0 %v682_v3  ;;  %649 = vmatpush3.bf16.msra.mxu1 %v682_v3 }
  0x20   : > { %621 = vmatprep.subr.bf16.mxu0 %v683_v4  ;;  %642 = vmatprep.subr.bf16.mxu1 %v683_v4 }
  0x23   : > { %622 = vmatpush3.bf16.msra.mxu0 %v683_v4  ;;  %650 = vmatpush3.bf16.msra.mxu1 %v683_v4 }
  0x24   : > { %623 = vmatprep.subr.bf16.mxu0 %v684_v7  ;;  %643 = vmatprep.subr.bf16.mxu1 %v684_v7 }
  0x27   : > { %624 = vmatpush3.bf16.msra.mxu0 %v684_v7  ;;  %651 = vmatpush3.bf16.msra.mxu1 %v684_v7 }
  0x28   : > { %625 = vmatprep.subr.bf16.mxu0 %v685_v8  ;;  %644 = vmatprep.subr.bf16.mxu1 %v685_v8 }
  0x2b   : > { %626 = vmatpush3.bf16.msra.mxu0 %v685_v8  ;;  %652 = vmatpush3.bf16.msra.mxu1 %v685_v8 }
  0x2c   : > { %627 = vmatprep.subr.bf16.mxu0 %v686_v9  ;;  %645 = vmatprep.subr.bf16.mxu1 %v686_v9 }
  0x2f   : > { %628 = vmatpush3.bf16.msra.mxu0 %v686_v9  ;;  %653 = vmatpush3.bf16.msra.mxu1 %v686_v9 }
  0x30   : > { %629 = vmatprep.subr.bf16.mxu0 %v687_v10  ;;  %646 = vmatprep.subr.bf16.mxu1 %v687_v10 }
  0x33   : > { %630 = vmatpush3.bf16.msra.mxu0 %v687_v10  ;;  %654 = vmatpush3.bf16.msra.mxu1 %v687_v10 }
  0x36   : > { %632 = vmatmul.mubr.bf16.vlgmr.msra.gmra.mrb[0].mxu0 %v690_v11  ;;  %636 = vmatmul.mubr.bf16.vlgmr.msra.gmra.mrb[0].mxu1 %v691_v12 }
 0x109   : > { %v633_v14 = vpop.f32.mrb[0].mxu0  ;;  %v637_v16 = vpop.f32.mrb[0].mxu1 }
 0x10a   : > { %v412_v18 = vadd.f32 %v633_v14, %v586_v13  ;;  %v428_v19 = vadd.f32 %v637_v16, %v586_v13  ;;  %v403_v20 = vpop.f32.mrb[1].mxu0  ;;  %v419_v22 = vpop.f32.mrb[1].mxu1 }
 0x10b   : > { %v404_v24 = vadd.f32 %v586_v13, %v403_v20  ;;  %v420_v25 = vadd.f32 %v586_v13, %v419_v22  ;;  %v634_v26 = vpop.f32.mrb[2].mxu0  ;;  %v638_v28 = vpop.f32.mrb[2].mxu1 }
 0x10c   : > { %v444_v30 = vsub.f32 %v412_v18, %v436_v15  ;;  %v448_v31 = vsub.f32 %v428_v19, %v440_v17  ;;  %v415_v32 = vadd.f32 %v634_v26, %v586_v13  ;;  %v431_v33 = vadd.f32 %v638_v28, %v586_v13  ;;  %v406_v34 = vpop.f32.mrb[3].mxu0  ;;  %v422_v36 = vpop.f32.mrb[3].mxu1  ;;  %v497_v28 = vld [vmem:[#allocation2] sm:$0xff] }
 0x10d   : > { %v442_v38 = vsub.f32 %v404_v24, %v434_v21  ;;  %v446_v39 = vsub.f32 %v420_v25, %v438_v23  ;;  %v407_v40 = vadd.f32 %v586_v13, %v406_v34  ;;  %v423_v41 = vadd.f32 %v586_v13, %v422_v36 }
 0x10e   : > { %v452_v42 = vand.u32 2147483647, %v444_v30  ;;  %v456_v43 = vand.u32 2147483647, %v448_v31  ;;  %v445_v44 = vsub.f32 %v415_v32, %v437_v27  ;;  %v449_v45 = vsub.f32 %v431_v33, %v441_v29 }
 0x10f   : > { %v450_v46 = vand.u32 2147483647, %v442_v38  ;;  %v454_v47 = vand.u32 2147483647, %v446_v39  ;;  %v443_v48 = vsub.f32 %v407_v40, %v435_v35  ;;  %v447_v49 = vsub.f32 %v423_v41, %v439_v37 }
 0x110   : > { %v460_v50 = vmin.f32 %v452_v42, 1.0  ;;  %v464_v51 = vmin.f32 %v456_v43, 1.0  ;;  %v453_v52 = vand.u32 2147483647, %v445_v44  ;;  %v457_v53 = vand.u32 2147483647, %v449_v45 }
 0x111   : > { %v458_v54 = vmin.f32 %v450_v46, 1.0  ;;  %v462_v55 = vmin.f32 %v454_v47, 1.0  ;;  %v451_v56 = vand.u32 2147483647, %v443_v48  ;;  %v455_v57 = vand.u32 2147483647, %v447_v49 }
 0x112   : > { %v468_v58 = vmul.f32 0.5, %v460_v50  ;;  %v472_v59 = vmul.f32 0.5, %v464_v51  ;;  %v461_v60 = vmin.f32 %v453_v52, 1.0  ;;  %v465_v61 = vmin.f32 %v457_v53, 1.0 }
 0x113   : > { %v466_v62 = vmul.f32 0.5, %v458_v54  ;;  %v470_v63 = vmul.f32 0.5, %v462_v55  ;;  %v459_v0 = vmin.f32 %v451_v56, 1.0  ;;  %v463_v1 = vmin.f32 %v455_v57, 1.0 }
 0x114   : > { %v476_v2 = vsub.f32 %v452_v42, %v468_v58  ;;  %v480_v3 = vsub.f32 %v456_v43, %v472_v59  ;;  %v469_v4 = vmul.f32 0.5, %v461_v60  ;;  %v473_v5 = vmul.f32 0.5, %v465_v61 }
 0x115   : > { %v474_v6 = vsub.f32 %v450_v46, %v466_v62  ;;  %v478_v7 = vsub.f32 %v454_v47, %v470_v63  ;;  %v467_v8 = vmul.f32 0.5, %v459_v0  ;;  %v471_v9 = vmul.f32 0.5, %v463_v1 }
 0x116   : > { %v477_v10 = vsub.f32 %v453_v52, %v469_v4  ;;  %v481_v11 = vsub.f32 %v457_v53, %v473_v5  ;;  %v484_v14 = vmul.f32 %v476_v2, %v460_v50  ;;  %v488_v15 = vmul.f32 %v480_v3, %v464_v51 }
 0x117   : > { %v475_v12 = vsub.f32 %v451_v56, %v467_v8  ;;  %v479_v13 = vsub.f32 %v455_v57, %v471_v9  ;;  %v482_v18 = vmul.f32 %v474_v6, %v458_v54  ;;  %v486_v19 = vmul.f32 %v478_v7, %v462_v55 }
 0x118   : > { %v485_v16 = vmul.f32 %v477_v10, %v461_v60  ;;  %v489_v17 = vmul.f32 %v481_v11, %v465_v61 }
 0x119   : > { %v483_v20 = vmul.f32 %v475_v12, %v459_v0  ;;  %v487_v21 = vmul.f32 %v479_v13, %v463_v1 }
 0x11a   : > { %v491_v22 = vadd.f32 %v485_v16, %v484_v14  ;;  %v493_v23 = vadd.f32 %v489_v17, %v488_v15 }
 0x11b   : > { %v490_v24 = vadd.f32 %v483_v20, %v482_v18  ;;  %v492_v25 = vadd.f32 %v487_v21, %v486_v19 }
 0x11d   : > { %v494_v26 = vadd.f32 %v491_v22, %v490_v24  ;;  %v495_v27 = vadd.f32 %v493_v23, %v492_v25  ;;  %503 = sbr.rel (%p599_p6) target bundleno = 300 (0x12c), region = 44 }
 0x11f   : > { %v496_v29 = vadd.f32 %v495_v27, %v494_v26 }
 0x121   : > { %v498_v30 = vadd.f32 %v497_v28, %v496_v29 }
 0x123   : > { %499 = vst [vmem:[#allocation2] sm:$0xff] %v498_v30 }
 0x12a   : > { %v504_v31 = vld [vmem:[#allocation2] sm:$0xff] }
 0x12b   : > { %505 = vst [vmem:[%s830_s4] sm:$0xff] %v504_v31 }
 0x12c PF: > { %s14_s17 = sadd.s32 1, %s714_s17   ;;  %s831_s15 = smov %s710_s16 }
 0x12d   : > { %p11_p7 = scmp.ge.s32.totalorder %s14_s17, 5   ;;  %s832_s16 = smov %s834_s18 }
 0x12f   :  { %13 = sbr.rel (!%p11_p7) target bundleno = 2 (0x2), region = 77 }

</bundles_post_ra>
